<compile_context>
chip_gen: v7x
topology: tpu7x:2x2x1
jax: 0.10.0
libtpu: 0.0.40
codegen_flags: <defaults>
</compile_context>

<pallas_src>
import jax
import jax.numpy as jnp
from jax.experimental import pallas as pl
from jax.experimental.pallas import tpu as pltpu

# Small shapes consistent with the bundled-input use case.
N, CIN, H, W = 2, 4, 16, 16
COUT = 8
KH = KW = 3
K_IM2COL = KH * KW * CIN        # 36
HW = H * W                      # 256
NHW = N * HW                    # 512 = 4 x 128 -> lane-dense last dim


def conv3x3_relu_kernel(p_ref, w_ref, b_ref, o_ref):
    # p_ref: [36, 512]  bf16 im2col patches, batch fused onto the lane axis
    # w_ref: [8, 36]    bf16 conv weight reshaped to (out, tap*cin)
    # b_ref: [8, 1]     f32 bias
    # o_ref: [8, 512]   f32 output = (COUT, N*H*W), lane-dense unmasked stores
    # Single fused MXU matmul for the whole batch: [8,36] @ [36,512] -> [8,512]
    acc = jnp.dot(w_ref[...], p_ref[...], preferred_element_type=jnp.float32)
    # bias + ReLU on the f32 accumulator (single broadcast, hidden under MXU drain)
    o_ref[...] = jnp.maximum(acc + b_ref[...], 0.0).astype(o_ref.dtype)


def _conv3x3_relu_pallas(x_nchw, w_oihw, bias):
    # ---- layout glue (pure JAX). Under jit this collapses into one fusion,
    # and allow_input_fusion lets XLA pull it into the pallas_call operand.
    x = x_nchw.astype(jnp.float32)
    xp = jnp.pad(x, ((0, 0), (0, 0), (1, 1), (1, 1)))            # [N, CIN, H+2, W+2]
    taps = [xp[:, :, dy:dy + H, dx:dx + W]                        # 9 x [N, CIN, H, W]
            for dy in range(KH) for dx in range(KW)]
    patches = jnp.stack(taps, axis=0)                             # [9, N, CIN, H, W]
    patches = jnp.transpose(patches, (0, 2, 1, 3, 4))             # [9, CIN, N, H, W]
    patches = patches.reshape(K_IM2COL, NHW).astype(jnp.bfloat16)  # [36, 512] bf16

    # weight OIHW -> [COUT, (dy, dx, cin)] to match the patch row ordering
    w2 = jnp.transpose(w_oihw, (0, 2, 3, 1)).reshape(COUT, K_IM2COL).astype(jnp.bfloat16)
    b2 = bias.reshape(COUT, 1).astype(jnp.float32)

    out = pl.pallas_call(
        conv3x3_relu_kernel,
        out_shape=jax.ShapeDtypeStruct((COUT, NHW), jnp.float32),
        grid=(1,),                                                # single step, whole batch
        in_specs=[
            pl.BlockSpec((K_IM2COL, NHW), lambda i: (0, 0)),
            pl.BlockSpec((COUT, K_IM2COL), lambda i: (0, 0)),
            pl.BlockSpec((COUT, 1), lambda i: (0, 0)),
        ],
        out_specs=pl.BlockSpec((COUT, NHW), lambda i: (0, 0)),
        compiler_params=pltpu.CompilerParams(
            dimension_semantics=("arbitrary",),
            # hint: fuse the im2col producer into the pallas_call operand
            allow_input_fusion=[True, False, False],
        ),
    )(patches, w2, b2)

    # [COUT, N*HW] -> NCHW: tiny ~16 KB reshape/transpose in the wrapper.
    return jnp.transpose(out.reshape(COUT, N, H, W), (1, 0, 2, 3))


# Jit the whole forward so the wrapper-side im2col fuses into a single XLA
# fusion (one bf16 write) instead of a chain of separately-dispatched ops.
_conv3x3_relu_jit = jax.jit(_conv3x3_relu_pallas)


class SelfContainedModelBundleInputPallas:
    """Mirrors SelfContainedModelBundleInput: data is bundled at construction,
    forward() takes no arguments and runs the wrapped model on the bundle."""

    def __init__(self, weight_oihw, bias, bundled_data_nchw):
        self.weight = weight_oihw
        self.bias = bias
        # the "bundled input" (equivalent of get_all_bundled_inputs()[0])
        self.bundled_inputs = (bundled_data_nchw,)

    def forward(self):
        (x,) = self.bundled_inputs
        return _conv3x3_relu_jit(x, self.weight, self.bias)


if __name__ == "__main__":
    key = jax.random.PRNGKey(0)
    kx, kw, kb = jax.random.split(key, 3)

    # deterministic bundled input and deterministic parameters (no checkpoint)
    bundled_x = jax.random.normal(kx, (N, CIN, H, W), dtype=jnp.float32)
    weight = 0.1 * jax.random.normal(kw, (COUT, CIN, KH, KW), dtype=jnp.float32)
    bias = 0.01 * jax.random.normal(kb, (COUT,), dtype=jnp.float32)

    model = SelfContainedModelBundleInputPallas(weight, bias, bundled_x)
    out = jax.block_until_ready(model.forward())

    # correctness check against a pure-JAX f32 reference conv (NCHW semantics);
    # tolerance relaxed because kernel inputs are bf16 (MXU-native path).
    ref = jax.lax.conv_general_dilated(
        bundled_x, weight, window_strides=(1, 1), padding=((1, 1), (1, 1)),
        dimension_numbers=("NCHW", "OIHW", "NCHW"))
    ref = jnp.maximum(ref + bias[None, :, None, None], 0.0)
    assert out.shape == (N, COUT, H, W)
    assert jnp.allclose(out, ref, atol=2e-2, rtol=2e-2)

    print("KERNEL_OK")
</pallas_src>

<mosaic_0001>
module attributes {stable_mosaic.version = 11 : i64} {
  func.func @conv3x3_relu_kernel(%arg0: i32, %arg1: memref<36x512xbf16, #tpu.memory_space<vmem>>, %arg2: memref<8x36xbf16, #tpu.memory_space<vmem>>, %arg3: memref<8x1xf32, #tpu.memory_space<vmem>>, %arg4: memref<8x512xf32, #tpu.memory_space<vmem>>) attributes {dimension_semantics = [#tpu.dimension_semantics<arbitrary>], iteration_bounds = array<i64: 1>, scalar_prefetch = 0 : i64, scratch_operands = 0 : i64, tpu.core_type = #tpu.core_type<tc>, window_params = [{pipeline_mode = #tpu.pipeline_mode<synchronous>, transform_indices = @transform_0, window_bounds = array<i64: 36, 512>}, {pipeline_mode = #tpu.pipeline_mode<synchronous>, transform_indices = @transform_1, window_bounds = array<i64: 8, 36>}, {pipeline_mode = #tpu.pipeline_mode<synchronous>, transform_indices = @transform_2, window_bounds = array<i64: 8, 1>}, {pipeline_mode = #tpu.pipeline_mode<synchronous>, transform_indices = @transform_3, window_bounds = array<i64: 8, 512>}]} {
    %c0 = arith.constant 0 : index
    %c0_0 = arith.constant 0 : index
    %0 = vector.load %arg2[%c0, %c0_0] : memref<8x36xbf16, #tpu.memory_space<vmem>>, vector<8x36xbf16>
    %c0_1 = arith.constant 0 : index
    %c0_2 = arith.constant 0 : index
    %1 = vector.load %arg1[%c0_1, %c0_2] : memref<36x512xbf16, #tpu.memory_space<vmem>>, vector<36x512xbf16>
    %cst = arith.constant dense<0.000000e+00> : vector<8x512xf32>
    %2 = tpu.matmul %0, %1, %cst {dimension_numbers = #tpu.dot_dimension_numbers<[1], [0], [0], [1], [0, 0, 1, 1], [], []>} : vector<8x36xbf16>, vector<36x512xbf16>, vector<8x512xf32> -> vector<8x512xf32>
    %c0_3 = arith.constant 0 : index
    %c0_4 = arith.constant 0 : index
    %3 = vector.load %arg3[%c0_3, %c0_4] : memref<8x1xf32, #tpu.memory_space<vmem>>, vector<8x1xf32>
    %4 = vector.broadcast %3 : vector<8x1xf32> to vector<8x512xf32>
    %5 = arith.addf %2, %4 : vector<8x512xf32>
    %cst_5 = arith.constant 0.000000e+00 : f32
    %6 = vector.broadcast %cst_5 : f32 to vector<8x512xf32>
    %7 = arith.maximumf %5, %6 : vector<8x512xf32>
    %c0_6 = arith.constant 0 : index
    %c0_7 = arith.constant 0 : index
    %8 = vector.load %arg4[%c0_6, %c0_7] : memref<8x512xf32, #tpu.memory_space<vmem>>, vector<8x512xf32>
    tpu.vector_store %arg4[%c0_6, %c0_7], %7 {strides = array<i32>} : memref<8x512xf32, #tpu.memory_space<vmem>>, vector<8x512xf32>,
    return
  }
  func.func @transform_0(%arg0: i32) -> (i32, i32) {
    %c0_i32 = arith.constant 0 : i32
    %c0_i32_0 = arith.constant 0 : i32
    %c0_i32_1 = arith.constant 0 : i32
    return %c0_i32, %c0_i32_0 : i32, i32
  }
  func.func @transform_1(%arg0: i32) -> (i32, i32) {
    %c0_i32 = arith.constant 0 : i32
    %c0_i32_0 = arith.constant 0 : i32
    %c0_i32_1 = arith.constant 0 : i32
    return %c0_i32, %c0_i32_0 : i32, i32
  }
  func.func @transform_2(%arg0: i32) -> (i32, i32) {
    %c0_i32 = arith.constant 0 : i32
    %c0_i32_0 = arith.constant 0 : i32
    %c0_i32_1 = arith.constant 0 : i32
    return %c0_i32, %c0_i32_0 : i32, i32
  }
  func.func @transform_3(%arg0: i32) -> (i32, i32) {
    %c0_i32 = arith.constant 0 : i32
    %c0_i32_0 = arith.constant 0 : i32
    %c0_i32_1 = arith.constant 0 : i32
    return %c0_i32, %c0_i32_0 : i32, i32
  }
}

</mosaic_0001>

<bundles_post_ra>
// kernel: _conv3x3_relu_pallas.1
= control target key start
LH: loop header
LB: loop body
LE: loop exit
PB: predicated region body
PF: predicated region fallthrough
CT: control target
= control target key end

     0   :  { %v227_v1 = vmov 0   ;;  %vm86_vm0 = vcmask 1041408   ;;  %vm82_vm1 = vcmask 293888   ;;  %s300_s0 = inlined_call_operand.vmem [shape: bf16[36,512], index: 0, kind: input, shape index: {}]   ;;  %s301_s2 = inlined_call_operand.vmem [shape: f32[8,1], index: 2, kind: input, shape index: {}]   ;;  %s302_s1 = inlined_call_operand.vmem [shape: bf16[8,36], index: 1, kind: input, shape index: {}]   ;;  %s303_s3 = inlined_call_operand.vmem [shape: f32[8,512], index: 3, kind: output, shape index: {}]  }
   0x1   :  { %v211_v0 = vld [vmem:[%s300_s0 + $0x4] ss:$16 sps:$4 sm:$0xff]   ;;  %131 = vmatprep.mubr.bf16.mxu0 %v227_v1  ;;  %172 = vmatprep.mubr.bf16.mxu1 %v227_v1  ;;  %v213_v2 = vld [vmem:[%s300_s0 + $0xc] ss:$16 sps:$4 sm:$0xff]   ;;  %v215_v3 = vld [vmem:[%s300_s0] ss:$16 sps:$4 sm:$0xff]  }
   0x2   :  { %210 = vset.pattern.permute.xlu0 %v227_v1  ;;  %99 = vmatprep.subr.bf16.mxu0 %v211_v0  ;;  %v216_v4 = vld [vmem:[%s300_s0 + $0x8] ss:$16 sps:$4 sm:$0xff]   ;;  %v217_v5 = vld [vmem:[%s300_s0 + $0x24] ss:$16 sps:$4 sm:$0xff]   ;;  %v219_v6 = vld [vmem:[%s300_s0 + $0x2c] ss:$16 sps:$4 sm:$0xff]  }
   0x3   :  { %140 = vmatprep.subr.bf16.mxu1 %v213_v2  ;;  %100 = vmatpush1.bf16.msra.mxu0 %v215_v3  ;;  %v221_v7 = vld [vmem:[%s300_s0 + $0x20] ss:$16 sps:$4 sm:$0xff]   ;;  %v222_v8 = vld [vmem:[%s300_s0 + $0x28] ss:$16 sps:$4 sm:$0xff]  }
   0x4   :  { %141 = vmatpush1.bf16.msra.mxu1 %v216_v4  ;;  %101 = vmatprep.subr.bf16.mxu0 %v217_v5  ;;  %v24_v9 = vld [vmem:[%s300_s0 + $0x40] sm:$0x33]  ;;  %v25_v10 = vld [vmem:[%s300_s0 + $0x48] sm:$0x33] }
   0x5   :  { %142 = vmatprep.subr.bf16.mxu1 %v219_v6  ;;  %v202_v11 = vcombine.high %v24_v9, %v24_v9  ;;  %v204_v12 = vcombine.high %v25_v10, %v25_v10  ;;  %v201_v13 = vcombine.low %v24_v9, %v24_v9  ;;  %v203_v14 = vcombine.low %v25_v10, %v25_v10  ;;  %v26_v15 = vld [vmem:[%s301_s2] sm:$0xff] }
   0x6   :  { %29 = vperm.xlu0 %210, %v26_v15   ;;  %v15_v18 = vld [vmem:[%s302_s1] sm:$0xf] }
   0x7   :  { %102 = vmatpush1.bf16.msra.mxu0 %v221_v7  ;;  %v88_v16 = vsel %vm86_vm0, %v201_v13, 0  ;;  %v94_v17 = vsel %vm86_vm0, %v203_v14, 0 }
   0x8   :  { %143 = vmatpush1.bf16.msra.mxu1 %v222_v8  ;;  %205 = vmatprep.subr.msk.bf16.mxu0 %vm86_vm0, %v202_v11 }
   0x9   :  { %207 = vmatprep.subr.msk.bf16.mxu1 %vm86_vm0, %v204_v12 }
   0xb   :  { %104 = vmatpush1.bf16.msra.mxu0 %v88_v16 }
   0xc   :  { %145 = vmatpush1.bf16.msra.mxu1 %v94_v17 }
   0xe   :  { %206 = vmatmul.mubr.msk.bf16.vlgmr.msra.gmra.mrb[0].mxu0 %vm82_vm1, %v15_v18 }
   0xf   :  { %208 = vmatmul.mubr.msk.bf16.vlgmr.msra.gmra.mrb[0].mxu1 %vm82_vm1, %v15_v18 }
  0x85   :  { %v30_v19 = vpop.permute.xlu0 %29 }
  0xe1   :  { %v133_v20 = vpop.f32.mrb[0].mxu0 }
  0xe2   :  { %v174_v21 = vpop.f32.mrb[0].mxu1  ;;  %v134_v22 = vadd.f32 %v133_v20, %v30_v19  ;;  %v135_v24 = vpop.f32.mrb[1].mxu0 }
  0xe3   :  { %v175_v23 = vadd.f32 %v174_v21, %v30_v19  ;;  %v176_v25 = vpop.f32.mrb[1].mxu1  ;;  %v136_v26 = vadd.f32 %v135_v24, %v30_v19  ;;  %v137_v28 = vpop.f32.mrb[2].mxu0 }
  0xe4   :  { %v177_v27 = vadd.f32 %v176_v25, %v30_v19  ;;  %v178_v29 = vpop.f32.mrb[2].mxu1  ;;  %v181_v30 = vmax.f32 %v134_v22, 0.0  ;;  %v138_v32 = vpop.f32.mrb[3].mxu0 }
  0xe5   :  { %v183_v31 = vmax.f32 %v175_v23, 0.0  ;;  %v179_v33 = vpop.f32.mrb[3].mxu1  ;;  %v182_v34 = vmax.f32 %v136_v26, 0.0 }
  0xe6   :  { %v184_v35 = vmax.f32 %v177_v27, 0.0  ;;  %185 = vst [vmem:[%s303_s3] sm:$0xff] %v181_v30 }
  0xe7   :  { %187 = vst [vmem:[%s303_s3 + $0x10] sm:$0xff] %v183_v31  ;;  %186 = vst [vmem:[%s303_s3 + $0x8] sm:$0xff] %v182_v34 }
  0xe8   :  { %188 = vst [vmem:[%s303_s3 + $0x18] sm:$0xff] %v184_v35 }

</bundles_post_ra>
